<compile_context>
chip_gen: v7x
topology: tpu7x:2x2x1
jax: 0.10.0
libtpu: 0.0.40
codegen_flags: <defaults>
</compile_context>

<pallas_src>
import jax
import jax.numpy as jnp
from jax.experimental import pallas as pl
from jax.experimental.pallas import tpu as pltpu

L2NORM_EPS = 1e-10


def _round_up(n, m):
    return (n + m - 1) // m * m


def _l2norm_kernel(x_ref, o_ref):
    x = x_ref[...].astype(jnp.float32)                        # (tb, D) block
    s = jnp.sum(x * x, axis=-1, keepdims=True) + L2NORM_EPS   # XLU lane reduce
    inv = jax.lax.rsqrt(s)                                    # EUP, tb scalars
    o_ref[...] = (x * inv).astype(o_ref.dtype)                # broadcast VPU mul


def _pick_block_rows(B, D, max_working_set_bytes=16 * 1024 * 1024):
    # Double-buffered in + out blocks: 4 * tb * D * 4 bytes <= budget.
    # tb is a multiple of 8 (sublane) and at least 8; capped at what B needs.
    cap = max(8, (max_working_set_bytes // (16 * D)) // 8 * 8)   # 8192 for D=128
    return min(_round_up(B, 8), cap)


def l2norm(x, *, block_rows=None):
    """L2-normalize rows of a (B, D) array, matching the PyTorch L2Norm module."""
    B, D = x.shape
    tb = block_rows if block_rows is not None else _pick_block_rows(B, D)

    return pl.pallas_call(
        _l2norm_kernel,
        out_shape=jax.ShapeDtypeStruct((B, D), x.dtype),
        grid=(pl.cdiv(B, tb),),                      # ragged last block is masked
        in_specs=[pl.BlockSpec((tb, D), lambda i: (i, 0))],
        out_specs=pl.BlockSpec((tb, D), lambda i: (i, 0)),
        compiler_params=pltpu.CompilerParams(
            dimension_semantics=("parallel",),
            vmem_limit_bytes=32 * 1024 * 1024,       # covers v5e's 16 MiB default
        ),
    )(x)


def _l2norm_ref(x):
    xf = jnp.asarray(x, jnp.float32)
    norm = jnp.sqrt(jnp.sum(xf * xf, axis=1, keepdims=True) + L2NORM_EPS)
    return (xf / norm).astype(x.dtype)


if __name__ == "__main__":
    key = jax.random.PRNGKey(0)

    # Case 1: tiny batch, HardNet descriptor width (D=128), single block.
    B, D = 2, 128
    x = jax.random.normal(key, (B, D), jnp.float32)
    out = jax.block_until_ready(l2norm(x))
    assert out.shape == (B, D), out.shape
    ref = _l2norm_ref(x)
    assert bool(jnp.all(jnp.abs(out - ref) < 1e-5))
    norms = jnp.sqrt(jnp.sum(out * out, axis=1))
    assert bool(jnp.all(jnp.abs(norms - 1.0) < 1e-4)), norms

    # Case 2: B not a multiple of the tile -> multi-block grid with a ragged,
    # store-masked last block (no padding, no output slice in the wrapper).
    B2 = 300
    x2 = jax.random.normal(jax.random.fold_in(key, 1), (B2, D), jnp.float32)
    out2 = jax.block_until_ready(l2norm(x2, block_rows=128))
    assert out2.shape == (B2, D), out2.shape
    ref2 = _l2norm_ref(x2)
    assert bool(jnp.all(jnp.abs(out2 - ref2) < 1e-5))
    norms2 = jnp.sqrt(jnp.sum(out2 * out2, axis=1))
    assert bool(jnp.all(jnp.abs(norms2 - 1.0) < 1e-4))

    print("KERNEL_OK")
</pallas_src>

<mosaic_0001>
module attributes {stable_mosaic.version = 11 : i64} {
  func.func @_l2norm_kernel(%arg0: i32, %arg1: memref<8x128xf32, #tpu.memory_space<vmem>>, %arg2: memref<8x128xf32, #tpu.memory_space<vmem>>) attributes {dimension_semantics = [#tpu.dimension_semantics<parallel>], iteration_bounds = array<i64: 1>, scalar_prefetch = 0 : i64, scratch_operands = 0 : i64, tpu.core_type = #tpu.core_type<tc>, window_params = [{transform_indices = @transform_0, window_bounds = array<i64: 8, 128>}, {transform_indices = @transform_1, window_bounds = array<i64: 8, 128>}]} {
    %c0 = arith.constant 0 : index
    %c0_0 = arith.constant 0 : index
    %0 = vector.load %arg1[%c0, %c0_0] : memref<8x128xf32, #tpu.memory_space<vmem>>, vector<8x128xf32>
    %1 = arith.mulf %0, %0 : vector<8x128xf32>
    %cst = arith.constant dense<0.000000e+00> : vector<8xf32>
    %2 = vector.multi_reduction <add>, %1, %cst [1] : vector<8x128xf32> to vector<8xf32>
    %3 = vector.shape_cast %2 : vector<8xf32> to vector<8x1xf32>
    %cst_1 = arith.constant 1.000000e-10 : f32
    %4 = vector.broadcast %cst_1 : f32 to vector<8x1xf32>
    %5 = arith.addf %3, %4 : vector<8x1xf32>
    %6 = math.rsqrt %5 : vector<8x1xf32>
    %7 = vector.broadcast %6 : vector<8x1xf32> to vector<8x128xf32>
    %8 = arith.mulf %0, %7 : vector<8x128xf32>
    %c0_2 = arith.constant 0 : index
    %c0_3 = arith.constant 0 : index
    %9 = vector.load %arg2[%c0_2, %c0_3] : memref<8x128xf32, #tpu.memory_space<vmem>>, vector<8x128xf32>
    tpu.vector_store %arg2[%c0_2, %c0_3], %8 {strides = array<i32>} : memref<8x128xf32, #tpu.memory_space<vmem>>, vector<8x128xf32>,
    return
  }
  func.func @transform_0(%arg0: i32) -> (i32, i32) {
    %c0_i32 = arith.constant 0 : i32
    %c0_i32_0 = arith.constant 0 : i32
    return %arg0, %c0_i32 : i32, i32
  }
  func.func @transform_1(%arg0: i32) -> (i32, i32) {
    %c0_i32 = arith.constant 0 : i32
    %c0_i32_0 = arith.constant 0 : i32
    return %arg0, %c0_i32 : i32, i32
  }
}

</mosaic_0001>

<bundles_post_ra>
// kernel: tpu_custom_call.1
= control target key start
LH: loop header
LB: loop body
LE: loop exit
PB: predicated region body
PF: predicated region fallthrough
CT: control target
= control target key end

     0   :  { %6 = vsyncpa [#allocation3], 0  ;;  %s146_s0 = inlined_call_operand.hbm [shape: f32[2,128], index: 0, kind: input, shape index: {}]   ;;  %s147_s1 = inlined_call_operand.hbm [shape: f32[2,128], index: 1, kind: output, shape index: {}]  }
   0x1   :  { %7 = vsyncpa [#allocation4], 0 }
   0x2   :  { %12 = vsyncadd [#allocation3], 96  ;;  %s102_s6 = smov [#allocation2]   ;;  %s54_s10 = scalar_lea.hbm %s146_s0, 32 }
   0x3   :  { %s13_s7 = sshll.u32 %s102_s6, 4  ;;  %p55_p0 = scmp.ne.s32.totalorder %s146_s0, %s54_s10  ;;  %s14_s7 = int_to_ptr.vmem [resolvable:$true] %s13_s7 }
   0x4   :  { %p58_p1 = scmp.lt.u32.totalorder %s54_s10, %s146_s0 }
   0x6   :  { %p60_p2 = pnand %p58_p1, %p55_p0 }
   0x8   :  { %63 = shalt.err (!%p60_p2)
}
   0x9   :  { %s64_s15 = scalar_lea.vmem %s14_s7, 32  ;;  %s68_s16 = scalar_lea.vmem %s14_s7, 128 }
   0xa   :  { %p65_p3 = scmp.ne.s32.totalorder %s14_s7, %s64_s15  ;;  %p69_p4 = scmp.lt.s32.totalorder %s14_s7, %s14_s7 }
   0xb   :  { %p70_p5 = scmp.lt.s32.totalorder %s68_s16, %s64_s15 }
   0xd   :  { %p71_p6 = por %p70_p5, %p69_p4 }
   0xf   :  { %p72_p7 = pnand %p71_p6, %p65_p3 }
  0x11   :  { %75 = shalt.err (!%p72_p7)
}
  0x12   :  { %s103_s17 = smov 32   ;;  %s104_s18 = smov 2  }
  0x13   :  { %19 = dma.hbm_to_vmem [thread:$0]  %s146_s0, 32, %s14_s7, [#allocation3], %s103_s17, %s103_s17, %s104_s18  }
  0x14   :  { %98 = dma.done.wait [#allocation3], 128  }
  0x15   :  { %99 = vsyncadd [#allocation3], 4294967168  ;;  %v23_v0 = vld [vmem:[#allocation2] sm:$0xff] }
  0x16   :  { %v24_v1 = vmul.f32 %v23_v0, %v23_v0 }
  0x18   :  { %25 = vadd.xlane.f32.xlu0 %v24_v1 }
  0xa5   :  { %v26_v2 = vpop.xlane.xlu0 %25 }
  0xa6   :  { %v27_v3 = vadd.f32 1e-10, %v26_v2 }
  0xa8   :  { %52 = vrsqrt.f32 %v27_v3 }
  0xb2   :  { %v53_v4 = vpop.eup %52 }
  0xb3   :  { %v29_v5 = vmul.f32 %v53_v4, %v23_v0 }
  0xb5   :  { %30 = vst [vmem:[#allocation5] sm:$0xff] %v29_v5 }
  0xb6   :  { %35 = vsyncadd [#allocation4], 96  ;;  %s105_s21 = smov [#allocation5]  }
  0xb7   :  { %s36_s22 = sshll.u32 %s105_s21, 4  ;;  %s37_s22 = int_to_ptr.vmem [resolvable:$true] %s36_s22 }
  0xb8   :  { %s76_s23 = scalar_lea.vmem %s37_s22, 32  ;;  %s80_s24 = scalar_lea.vmem %s37_s22, 128 }
  0xb9   :  { %p77_p8 = scmp.ne.s32.totalorder %s37_s22, %s76_s23  ;;  %p81_p9 = scmp.lt.s32.totalorder %s37_s22, %s37_s22 }
  0xba   :  { %p82_p10 = scmp.lt.s32.totalorder %s80_s24, %s76_s23 }
  0xbc   :  { %p83_p11 = por %p82_p10, %p81_p9 }
  0xbe   :  { %p84_p12 = pnand %p83_p11, %p77_p8 }
  0xc0   :  { %87 = shalt.err (!%p84_p12)
}
  0xc1   :  { %s88_s26 = scalar_lea.hbm %s147_s1, 32 }
  0xc2   :  { %p89_p13 = scmp.ne.s32.totalorder %s147_s1, %s88_s26  ;;  %p92_p0 = scmp.lt.u32.totalorder %s88_s26, %s147_s1 }
  0xc4   :  { %p94_p1 = pnand %p92_p0, %p89_p13 }
  0xc6   :  { %97 = shalt.err (!%p94_p1)
}
  0xc7   :  { %42 = dma.vmem_to_hbm [thread:$0]  %s37_s22, 32, %s147_s1, [#allocation4], %s103_s17, %s103_s17, %s104_s18  }
  0xc8   :  { %100 = dma.done.wait [#allocation4], 128  }
  0xc9   :  { %101 = vsyncadd [#allocation4], 4294967168 }
  0xca   :  { %46 = vsyncpa [#allocation3], 1 }
  0xcb   :  { %47 = vsyncpa [#allocation4], 1 }

</bundles_post_ra>
